<compile_context>
chip_gen: v6e
topology: v6e:2x2x1
jax: 0.10.0
libtpu: 0.0.40
codegen_flags: <defaults>
</compile_context>

<pallas_src>
import functools
import math

import jax
import jax.numpy as jnp
from jax import lax
from jax.experimental import pallas as pl
from jax.experimental.pallas import tpu as pltpu


# ---------------------------------------------------------------------------
# Helpers
# ---------------------------------------------------------------------------
def _round_up(x, m):
    return ((x + m - 1) // m) * m


def _round_down(x, m):
    return (x // m) * m


def _vmem_limit_bytes():
    """Generation-aware scoped-VMEM limit: ~62% of physical VMEM
    (v5e/v6e: 128 MiB -> ~79 MiB; v7x: 64 MiB -> ~39 MiB). Falls back to the
    conservative v7x-sized figure if the query is unavailable."""
    cap = 64 * 1024 * 1024
    try:
        cap = int(pltpu.get_tpu_info().vmem_capacity_bytes)
    except Exception:
        pass
    return min(int(cap * 0.62), 100 * 1024 * 1024)


# ---------------------------------------------------------------------------
# Row/column tiled linear kernel (weight pre-transposed to (Din, Dout))
# ---------------------------------------------------------------------------
def _linear_kernel(x_ref, w_ref, b_ref, o_ref):
    # x: (TR, Din) @ w: (Din, TN) -> (TR, TN); f32 accumulation, output dtype.
    acc = jnp.dot(x_ref[...], w_ref[...], preferred_element_type=jnp.float32)
    o_ref[...] = (acc + b_ref[...].astype(jnp.float32)).astype(o_ref.dtype)


def _pick_linear_tiles(rows, din, dout, itemsize, vmem_limit):
    budget = int(vmem_limit * 0.7)
    # Output-column tile: weight block (Din, TN) is resident across the inner
    # row axis but double-buffered -> tile Dout when it would not fit.
    tn = dout
    if 2 * din * dout * itemsize > budget // 2 and dout > 128:
        cap = max(128, _round_down((budget // 2) // (2 * din * itemsize), 128))
        tn = 0
        for cand in range(min(cap, _round_down(dout, 128)), 127, -128):
            if dout % cand == 0:
                tn = cand
                break
        if tn == 0:
            tn = dout   # TODO(synk): pad Dout to a 128 multiple instead.
    # Row tile from what is left (x tile + out tile double-buffered + f32 acc).
    per_row = 2 * itemsize * din + 2 * itemsize * tn + 4 * tn
    left = budget - 2 * din * tn * itemsize - 2 * tn * itemsize
    tr = max(8, left // max(per_row, 1))
    tr = min(tr, 1024)
    tr = _round_down(tr, 128) if tr >= 128 else _round_down(tr, 8)
    tr = max(tr, 8)
    tr = min(tr, _round_up(rows, 8))
    return tr, tn


def pallas_linear(x, w_t, b):
    """y = x @ w_t + b.  x: (..., Din), w_t: (Din, Dout) (pre-transposed once
    at parameter-prep time), b: (Dout,).  Rows are padded to the tile size and
    pipelined; the weight column-block stays resident across the inner row
    axis.  f32 accumulation, output in x.dtype."""
    lead = x.shape[:-1]
    din = x.shape[-1]
    dout = w_t.shape[1]
    x2d = x.reshape(-1, din)
    rows = x2d.shape[0]
    vmem_limit = _vmem_limit_bytes()
    tr, tn = _pick_linear_tiles(rows, din, dout, x.dtype.itemsize, vmem_limit)
    rows_p = _round_up(rows, tr)
    if rows_p != rows:
        x2d = jnp.pad(x2d, ((0, rows_p - rows), (0, 0)))

    out = pl.pallas_call(
        _linear_kernel,
        grid=(dout // tn, rows_p // tr),      # rows innermost -> weight resident
        in_specs=[
            pl.BlockSpec((tr, din), lambda j, i: (i, 0)),
            pl.BlockSpec((din, tn), lambda j, i: (0, j)),
            pl.BlockSpec((1, tn), lambda j, i: (0, j)),
        ],
        out_specs=pl.BlockSpec((tr, tn), lambda j, i: (i, j)),
        out_shape=jax.ShapeDtypeStruct((rows_p, dout), x.dtype),
        compiler_params=pltpu.CompilerParams(
            dimension_semantics=("parallel", "parallel"),
            vmem_limit_bytes=vmem_limit),
    )(x2d, w_t, b.reshape(1, dout))

    if rows_p != rows:
        out = out[:rows]
    return out.reshape(*lead, dout)


# ---------------------------------------------------------------------------
# Multi-head attention kernel: one (batch, head, query-tile) per program
# ---------------------------------------------------------------------------
def _mha_kernel(q_ref, k_ref, v_ref, ctx_ref, attn_ref, *,
                inv_temperature, kv_valid):
    # q_ref: (TQ, Dk), k_ref: (LkP, Dk), v_ref: (LkP, Dv)
    # ctx_ref: (TQ, Dv), attn_ref: (TQ, LkP)
    # Fold 1/temperature into Q: O(TQ*Dk) instead of scaling O(TQ*Lk) scores.
    q = q_ref[...] * inv_temperature
    # q @ k^T via last-dim contraction (no in-kernel transpose), f32 accum.
    s = lax.dot_general(
        q, k_ref[...],
        dimension_numbers=(((1,), (1,)), ((), ())),
        preferred_element_type=jnp.float32)                     # (TQ, LkP)
    if kv_valid is not None:                                    # Lk was padded
        mask = lax.broadcasted_iota(jnp.int32, s.shape, 1) < kv_valid
        s = jnp.where(mask, s, -jnp.inf)
    # Numerically stable softmax (mask=None module path).
    m = jnp.max(s, axis=-1, keepdims=True)
    e = jnp.exp(s - m)
    denom = jnp.sum(e, axis=-1, keepdims=True)
    # EUP approximate reciprocal + one Newton step: only O(TQ) inversions.
    inv = pl.reciprocal(denom, approx=True)
    inv = inv * (2.0 - denom * inv)
    p = e * inv                                                 # (TQ, LkP)
    attn_ref[...] = p.astype(attn_ref.dtype)                    # lane-dense store
    ctx = jnp.dot(p.astype(v_ref.dtype), v_ref[...],
                  preferred_element_type=jnp.float32)           # (TQ, Dv)
    ctx_ref[...] = ctx.astype(ctx_ref.dtype)


def _pick_attn_q_tile(lq, lkp, dk, dv, in_isz, attn_isz, vmem_limit):
    """Query tile derived from the real VMEM limit: subtract the resident
    (double-buffered) per-head K/V blocks and charge each query row for the
    q / ctx / attn tiles (x2 buffers) plus the f32 score temporaries."""
    budget = int(vmem_limit * 0.7)
    resident = 2 * in_isz * lkp * (dk + dv)            # K + V blocks
    per_row = (2 * in_isz * dk                         # q tile
               + 2 * in_isz * dv                       # ctx tile
               + 2 * attn_isz * lkp                    # attn tile
               + 3 * 4 * lkp)                          # f32 s / e / p temporaries
    avail = budget - resident
    tq = max(8, avail // per_row) if avail > 0 else 8
    tq = min(tq, 512)
    tq = _round_down(tq, 128) if tq >= 128 else _round_down(tq, 8)
    tq = max(tq, 8)
    return min(tq, _round_up(lq, 8))


def pallas_multihead_attention(q, k, v, *, temperature, attn_dtype=None):
    """
    q: (B, H, Lq, Dk)  k: (B, H, Lk, Dk)  v: (B, H, Lk, Dv)   (head-major)
    Returns:
      ctx  (B, H, Lq, Dv)
      attn (B, Lq, H, Lk)  -- written directly in the merged-head lane layout
                              (no transpose pass over the dominant stream).
    """
    B, H, Lq, Dk = q.shape
    Lk = k.shape[2]
    Dv = v.shape[3]
    in_dtype = q.dtype
    # TODO(synk): pass attn_dtype=jnp.bfloat16 to halve the dominant HBM write.
    attn_dtype = attn_dtype or in_dtype
    vmem_limit = _vmem_limit_bytes()

    lkp = _round_up(Lk, 128)        # 128-lane aligned, lane-dense attn blocks
    tq = _pick_attn_q_tile(Lq, lkp, Dk, Dv, in_dtype.itemsize,
                           jnp.dtype(attn_dtype).itemsize, vmem_limit)
    lqp = _round_up(Lq, tq)

    if lqp != Lq:
        q = jnp.pad(q, ((0, 0), (0, 0), (0, lqp - Lq), (0, 0)))
    if lkp != Lk:
        k = jnp.pad(k, ((0, 0), (0, 0), (0, lkp - Lk), (0, 0)))
        v = jnp.pad(v, ((0, 0), (0, 0), (0, lkp - Lk), (0, 0)))

    kernel = functools.partial(
        _mha_kernel,
        inv_temperature=1.0 / float(temperature),
        kv_valid=Lk if lkp != Lk else None)

    # Batch/head leading (v7x megacore splits over distinct K/V panels first),
    # query tiles innermost so each head's K/V block stays resident across them.
    grid = (B, H, lqp // tq)
    ctx, attn = pl.pallas_call(
        kernel,
        grid=grid,
        in_specs=[
            pl.BlockSpec((None, None, tq, Dk), lambda b, h, i: (b, h, i, 0)),
            pl.BlockSpec((None, None, lkp, Dk), lambda b, h, i: (b, h, 0, 0)),
            pl.BlockSpec((None, None, lkp, Dv), lambda b, h, i: (b, h, 0, 0)),
        ],
        out_specs=[
            pl.BlockSpec((None, None, tq, Dv), lambda b, h, i: (b, h, i, 0)),
            # attn goes straight into (B, LqP, H*LkP): lane-block index = head,
            # so every store is a 128-aligned lane-dense (TQ, LkP) panel and the
            # reshape to (B, Lq, H, Lk) afterwards is free.
            pl.BlockSpec((None, tq, lkp), lambda b, h, i: (b, i, h)),
        ],
        out_shape=[
            jax.ShapeDtypeStruct((B, H, lqp, Dv), in_dtype),
            jax.ShapeDtypeStruct((B, lqp, H * lkp), attn_dtype),
        ],
        compiler_params=pltpu.CompilerParams(
            dimension_semantics=("parallel", "parallel", "parallel"),
            vmem_limit_bytes=vmem_limit),
    )(q, k, v)

    ctx = ctx[:, :, :Lq, :]
    attn = attn.reshape(B, lqp, H, lkp)[:, :Lq, :, :Lk]
    return ctx, attn


# ---------------------------------------------------------------------------
# One-time parameter prep (hoisted out of the per-call path)
# ---------------------------------------------------------------------------
def prepare_params(params):
    """Fuse the K|V projection weights and pre-transpose every weight to
    (Din, Dout) so the kernels run plain row-major contractions with no
    per-tile RHS transpose and no per-call concatenation."""
    wkv = jnp.concatenate([params["wk"], params["wv"]], axis=0)
    bkv = jnp.concatenate([params["bk"], params["bv"]], axis=0)
    return {
        "wq_t": params["wq"].T, "bq": params["bq"],
        "wkv_t": wkv.T, "bkv": bkv,
        "wo_t": params["wo"].T, "bo": params["bo"],
    }


def general_multi_head_attention_forward(prep, x, attend_over, *, num_heads,
                                         temperature, attn_dtype=None):
    """
    x:           (B, Lq, input_dim)
    attend_over: (B, Lk, attend_dim)
    returns: context (B, Lq, output_dim), attn (B, Lq, H, Lk)
    """
    B, Lq, _ = x.shape
    _, Lk, _ = attend_over.shape
    h_dk = prep["wq_t"].shape[1]     # total_attention_dim
    h_dv = prep["wo_t"].shape[0]     # total_value_dim
    dk = h_dk // num_heads
    dv = h_dv // num_heads

    # Projections (fused K|V: attend_over is read from HBM once).
    q = pallas_linear(x, prep["wq_t"], prep["bq"])                 # (B,Lq,HDk)
    kv = pallas_linear(attend_over, prep["wkv_t"], prep["bkv"])    # (B,Lk,HDk+HDv)

    # Head-major layouts so every in-kernel access is a full-width, 128-lane
    # aligned panel.  These are single XLA copies over the *small* projection
    # tensors; the dominant attn stream stays transpose-free.
    qh = q.reshape(B, Lq, num_heads, dk).transpose(0, 2, 1, 3)
    kh = kv[..., :h_dk].reshape(B, Lk, num_heads, dk).transpose(0, 2, 1, 3)
    vh = kv[..., h_dk:].reshape(B, Lk, num_heads, dv).transpose(0, 2, 1, 3)

    ctx_h, attn = pallas_multihead_attention(
        qh, kh, vh, temperature=temperature, attn_dtype=attn_dtype)

    ctx = ctx_h.transpose(0, 2, 1, 3).reshape(B, Lq, h_dv)         # small copy
    context = pallas_linear(ctx, prep["wo_t"], prep["bo"])         # (B,Lq,Dout)
    return context, attn


def init_params(key, input_dim, attend_to_dim, total_attention_dim,
                total_value_dim, output_dim):
    """Deterministic synthetic parameters (PyTorch Linear layout: W (out, in))."""
    ks = jax.random.split(key, 8)
    def u(k, shape, fan_in):
        bound = 1.0 / math.sqrt(fan_in)
        return jax.random.uniform(k, shape, jnp.float32, -bound, bound)
    return {
        "wk": u(ks[0], (total_attention_dim, attend_to_dim), attend_to_dim),
        "bk": u(ks[1], (total_attention_dim,), attend_to_dim),
        "wv": u(ks[2], (total_value_dim, attend_to_dim), attend_to_dim),
        "bv": u(ks[3], (total_value_dim,), attend_to_dim),
        "wq": u(ks[4], (total_attention_dim, input_dim), input_dim),
        "bq": u(ks[5], (total_attention_dim,), input_dim),
        "wo": u(ks[6], (output_dim, total_value_dim), total_value_dim),
        "bo": u(ks[7], (output_dim,), total_value_dim),
    }


# ---------------------------------------------------------------------------
# Pure-JAX reference for validation
# ---------------------------------------------------------------------------
def _reference_forward(params, x, attend_over, *, num_heads, temperature):
    B, Lq, _ = x.shape
    _, Lk, _ = attend_over.shape
    keys = attend_over @ params["wk"].T + params["bk"]
    values = attend_over @ params["wv"].T + params["bv"]
    queries = x @ params["wq"].T + params["bq"]
    kd = keys.shape[-1] // num_heads
    vd = values.shape[-1] // num_heads
    keys = keys.reshape(B, Lk, num_heads, kd).transpose(0, 2, 3, 1)
    values = values.reshape(B, Lk, num_heads, vd).transpose(0, 2, 1, 3)
    queries = queries.reshape(B, Lq, num_heads, kd).transpose(0, 2, 1, 3)
    sim = jnp.einsum("bhqd,bhdk->bhqk", queries, keys) / temperature
    attn = jax.nn.softmax(sim, axis=-1)
    ctx = jnp.einsum("bhqk,bhkd->bhqd", attn, values)
    ctx = ctx.transpose(0, 2, 1, 3).reshape(B, Lq, -1)
    context = ctx @ params["wo"].T + params["bo"]
    return context, attn.transpose(0, 2, 1, 3)


if __name__ == "__main__":
    # Small shapes consistent with the module's forward.
    batch = 2
    seq_q = 8
    seq_k = 8
    input_dim = 32
    num_heads = 4
    total_attention_dim = 32
    total_value_dim = 32
    attend_to_dim = 32
    output_dim = 32
    key_dim = total_attention_dim // num_heads
    temperature = float(key_dim ** 0.5)

    root = jax.random.PRNGKey(0)
    k_p, k_x, k_a = jax.random.split(root, 3)
    params = init_params(k_p, input_dim, attend_to_dim, total_attention_dim,
                         total_value_dim, output_dim)
    x = jax.random.normal(k_x, (batch, seq_q, input_dim), jnp.float32)
    attend_over = jax.random.normal(k_a, (batch, seq_k, attend_to_dim),
                                    jnp.float32)

    prep = prepare_params(params)   # one-time weight prep, outside the jit
    fwd = jax.jit(functools.partial(general_multi_head_attention_forward,
                                    num_heads=num_heads,
                                    temperature=temperature))
    context, attn = fwd(prep, x, attend_over)
    jax.block_until_ready((context, attn))

    ref_ctx, ref_attn = _reference_forward(params, x, attend_over,
                                           num_heads=num_heads,
                                           temperature=temperature)
    assert context.shape == (batch, seq_q, output_dim)
    assert attn.shape == (batch, seq_q, num_heads, seq_k)
    # Tolerance covers the EUP approximate-reciprocal (+Newton) softmax
    # normalization and q-prescaling; everything accumulates in f32.
    assert jnp.allclose(context, ref_ctx, atol=2e-4, rtol=2e-4)
    assert jnp.allclose(attn, ref_attn, atol=2e-4, rtol=2e-4)

    print("KERNEL_OK")
</pallas_src>

<mosaic_0001>
module attributes {stable_mosaic.version = 11 : i64} {
  func.func @_linear_kernel(%arg0: i32, %arg1: i32, %arg2: memref<16x32xf32, #tpu.memory_space<vmem>>, %arg3: memref<32x32xf32, #tpu.memory_space<vmem>>, %arg4: memref<1x32xf32, #tpu.memory_space<vmem>>, %arg5: memref<16x32xf32, #tpu.memory_space<vmem>>) attributes {dimension_semantics = [#tpu.dimension_semantics<parallel>, #tpu.dimension_semantics<parallel>], iteration_bounds = array<i64: 1, 1>, scalar_prefetch = 0 : i64, scratch_operands = 0 : i64, tpu.core_type = #tpu.core_type<tc>, window_params = [{transform_indices = @transform_0, window_bounds = array<i64: 16, 32>}, {transform_indices = @transform_1, window_bounds = array<i64: 32, 32>}, {transform_indices = @transform_2, window_bounds = array<i64: 1, 32>}, {transform_indices = @transform_3, window_bounds = array<i64: 16, 32>}]} {
    %c0 = arith.constant 0 : index
    %c0_0 = arith.constant 0 : index
    %0 = vector.load %arg2[%c0, %c0_0] : memref<16x32xf32, #tpu.memory_space<vmem>>, vector<16x32xf32>
    %c0_1 = arith.constant 0 : index
    %c0_2 = arith.constant 0 : index
    %1 = vector.load %arg3[%c0_1, %c0_2] : memref<32x32xf32, #tpu.memory_space<vmem>>, vector<32x32xf32>
    %cst = arith.constant dense<0.000000e+00> : vector<16x32xf32>
    %2 = tpu.matmul %0, %1, %cst {dimension_numbers = #tpu.dot_dimension_numbers<[1], [0], [0], [1], [0, 0, 1, 1], [], []>} : vector<16x32xf32>, vector<32x32xf32>, vector<16x32xf32> -> vector<16x32xf32>
    %c0_3 = arith.constant 0 : index
    %c0_4 = arith.constant 0 : index
    %3 = vector.load %arg4[%c0_3, %c0_4] : memref<1x32xf32, #tpu.memory_space<vmem>>, vector<1x32xf32>
    %4 = vector.broadcast %3 : vector<1x32xf32> to vector<16x32xf32>
    %5 = arith.addf %2, %4 : vector<16x32xf32>
    %c0_5 = arith.constant 0 : index
    %c0_6 = arith.constant 0 : index
    %6 = vector.load %arg5[%c0_5, %c0_6] : memref<16x32xf32, #tpu.memory_space<vmem>>, vector<16x32xf32>
    tpu.vector_store %arg5[%c0_5, %c0_6], %5 {strides = array<i32>} : memref<16x32xf32, #tpu.memory_space<vmem>>, vector<16x32xf32>,
    return
  }
  func.func @transform_0(%arg0: i32, %arg1: i32) -> (i32, i32) {
    %c0_i32 = arith.constant 0 : i32
    %c0_i32_0 = arith.constant 0 : i32
    return %arg1, %c0_i32 : i32, i32
  }
  func.func @transform_1(%arg0: i32, %arg1: i32) -> (i32, i32) {
    %c0_i32 = arith.constant 0 : i32
    %c0_i32_0 = arith.constant 0 : i32
    return %c0_i32, %arg0 : i32, i32
  }
  func.func @transform_2(%arg0: i32, %arg1: i32) -> (i32, i32) {
    %c0_i32 = arith.constant 0 : i32
    %c0_i32_0 = arith.constant 0 : i32
    return %c0_i32, %arg0 : i32, i32
  }
  func.func @transform_3(%arg0: i32, %arg1: i32) -> (i32, i32) {
    %c0_i32 = arith.constant 0 : i32
    return %arg1, %arg0 : i32, i32
  }
}

module attributes {stable_mosaic.version = 11 : i64} {
  func.func @_linear_kernel(%arg0: i32, %arg1: i32, %arg2: memref<16x32xf32, #tpu.memory_space<vmem>>, %arg3: memref<32x64xf32, #tpu.memory_space<vmem>>, %arg4: memref<1x64xf32, #tpu.memory_space<vmem>>, %arg5: memref<16x64xf32, #tpu.memory_space<vmem>>) attributes {dimension_semantics = [#tpu.dimension_semantics<parallel>, #tpu.dimension_semantics<parallel>], iteration_bounds = array<i64: 1, 1>, scalar_prefetch = 0 : i64, scratch_operands = 0 : i64, tpu.core_type = #tpu.core_type<tc>, window_params = [{transform_indices = @transform_0, window_bounds = array<i64: 16, 32>}, {transform_indices = @transform_1, window_bounds = array<i64: 32, 64>}, {transform_indices = @transform_2, window_bounds = array<i64: 1, 64>}, {transform_indices = @transform_3, window_bounds = array<i64: 16, 64>}]} {
    %c0 = arith.constant 0 : index
    %c0_0 = arith.constant 0 : index
    %0 = vector.load %arg2[%c0, %c0_0] : memref<16x32xf32, #tpu.memory_space<vmem>>, vector<16x32xf32>
    %c0_1 = arith.constant 0 : index
    %c0_2 = arith.constant 0 : index
    %1 = vector.load %arg3[%c0_1, %c0_2] : memref<32x64xf32, #tpu.memory_space<vmem>>, vector<32x64xf32>
    %cst = arith.constant dense<0.000000e+00> : vector<16x64xf32>
    %2 = tpu.matmul %0, %1, %cst {dimension_numbers = #tpu.dot_dimension_numbers<[1], [0], [0], [1], [0, 0, 1, 1], [], []>} : vector<16x32xf32>, vector<32x64xf32>, vector<16x64xf32> -> vector<16x64xf32>
    %c0_3 = arith.constant 0 : index
    %c0_4 = arith.constant 0 : index
    %3 = vector.load %arg4[%c0_3, %c0_4] : memref<1x64xf32, #tpu.memory_space<vmem>>, vector<1x64xf32>
    %4 = vector.broadcast %3 : vector<1x64xf32> to vector<16x64xf32>
    %5 = arith.addf %2, %4 : vector<16x64xf32>
    %c0_5 = arith.constant 0 : index
    %c0_6 = arith.constant 0 : index
    %6 = vector.load %arg5[%c0_5, %c0_6] : memref<16x64xf32, #tpu.memory_space<vmem>>, vector<16x64xf32>
    tpu.vector_store %arg5[%c0_5, %c0_6], %5 {strides = array<i32>} : memref<16x64xf32, #tpu.memory_space<vmem>>, vector<16x64xf32>,
    return
  }
  func.func @transform_0(%arg0: i32, %arg1: i32) -> (i32, i32) {
    %c0_i32 = arith.constant 0 : i32
    %c0_i32_0 = arith.constant 0 : i32
    return %arg1, %c0_i32 : i32, i32
  }
  func.func @transform_1(%arg0: i32, %arg1: i32) -> (i32, i32) {
    %c0_i32 = arith.constant 0 : i32
    %c0_i32_0 = arith.constant 0 : i32
    return %c0_i32, %arg0 : i32, i32
  }
  func.func @transform_2(%arg0: i32, %arg1: i32) -> (i32, i32) {
    %c0_i32 = arith.constant 0 : i32
    %c0_i32_0 = arith.constant 0 : i32
    return %c0_i32, %arg0 : i32, i32
  }
  func.func @transform_3(%arg0: i32, %arg1: i32) -> (i32, i32) {
    %c0_i32 = arith.constant 0 : i32
    return %arg1, %arg0 : i32, i32
  }
}

module attributes {stable_mosaic.version = 11 : i64} {
  func.func @_mha_kernel(%arg0: i32, %arg1: i32, %arg2: i32, %arg3: memref<1x1x8x8xf32, #tpu.memory_space<vmem>>, %arg4: memref<1x1x128x8xf32, #tpu.memory_space<vmem>>, %arg5: memref<1x1x128x8xf32, #tpu.memory_space<vmem>>, %arg6: memref<1x1x8x8xf32, #tpu.memory_space<vmem>>, %arg7: memref<1x8x128xf32, #tpu.memory_space<vmem>>) attributes {dimension_semantics = [#tpu.dimension_semantics<parallel>, #tpu.dimension_semantics<parallel>, #tpu.dimension_semantics<parallel>], iteration_bounds = array<i64: 2, 4, 1>, scalar_prefetch = 0 : i64, scratch_operands = 0 : i64, tpu.core_type = #tpu.core_type<tc>, window_params = [{transform_indices = @transform_0, window_bounds = array<i64: 1, 1, 8, 8>}, {transform_indices = @transform_1, window_bounds = array<i64: 1, 1, 128, 8>}, {transform_indices = @transform_2, window_bounds = array<i64: 1, 1, 128, 8>}, {transform_indices = @transform_3, window_bounds = array<i64: 1, 1, 8, 8>}, {transform_indices = @transform_4, window_bounds = array<i64: 1, 8, 128>}]} {
    %c0 = arith.constant 0 : index
    %c0_0 = arith.constant 0 : index
    %c0_1 = arith.constant 0 : index
    %c0_2 = arith.constant 0 : index
    %0 = vector.load %arg3[%c0, %c0_0, %c0_1, %c0_2] : memref<1x1x8x8xf32, #tpu.memory_space<vmem>>, vector<1x1x8x8xf32>
    %1 = vector.shape_cast %0 : vector<1x1x8x8xf32> to vector<8x8xf32>
    %cst = arith.constant 0.353553385 : f32
    %2 = vector.broadcast %cst : f32 to vector<8x8xf32>
    %3 = arith.mulf %1, %2 : vector<8x8xf32>
    %c0_3 = arith.constant 0 : index
    %c0_4 = arith.constant 0 : index
    %c0_5 = arith.constant 0 : index
    %c0_6 = arith.constant 0 : index
    %4 = vector.load %arg4[%c0_3, %c0_4, %c0_5, %c0_6] : memref<1x1x128x8xf32, #tpu.memory_space<vmem>>, vector<1x1x128x8xf32>
    %5 = vector.shape_cast %4 : vector<1x1x128x8xf32> to vector<128x8xf32>
    %cst_7 = arith.constant dense<0.000000e+00> : vector<8x128xf32>
    %6 = tpu.matmul %3, %5, %cst_7 {dimension_numbers = #tpu.dot_dimension_numbers<[1], [1], [0], [0], [0, 0, 1, 0], [], []>} : vector<8x8xf32>, vector<128x8xf32>, vector<8x128xf32> -> vector<8x128xf32>
    %7 = tpu.iota {dimensions = array<i32: 1>} : vector<8x128xi32>
    %c8_i32 = arith.constant 8 : i32
    %8 = vector.broadcast %c8_i32 : i32 to vector<8x128xi32>
    %9 = arith.cmpi slt, %7, %8 : vector<8x128xi32>
    %cst_8 = arith.constant 0xFF800000 : f32
    %10 = vector.broadcast %cst_8 : f32 to vector<8x128xf32>
    %11 = arith.select %9, %6, %10 : vector<8x128xi1>, vector<8x128xf32>
    %cst_9 = arith.constant dense<0xFF800000> : vector<8xf32>
    %12 = vector.multi_reduction <maximumf>, %11, %cst_9 [1] : vector<8x128xf32> to vector<8xf32>
    %13 = vector.shape_cast %12 : vector<8xf32> to vector<8x1xf32>
    %14 = vector.broadcast %13 : vector<8x1xf32> to vector<8x128xf32>
    %15 = arith.subf %11, %14 : vector<8x128xf32>
    %16 = math.exp %15 : vector<8x128xf32>
    %cst_10 = arith.constant dense<0.000000e+00> : vector<8xf32>
    %17 = vector.multi_reduction <add>, %16, %cst_10 [1] : vector<8x128xf32> to vector<8xf32>
    %18 = vector.shape_cast %17 : vector<8xf32> to vector<8x1xf32>
    %19 = tpu.reciprocal %18 {approx = true} : vector<8x1xf32> -> vector<8x1xf32>
    %20 = arith.mulf %18, %19 : vector<8x1xf32>
    %cst_11 = arith.constant 2.000000e+00 : f32
    %21 = vector.broadcast %cst_11 : f32 to vector<8x1xf32>
    %22 = arith.subf %21, %20 : vector<8x1xf32>
    %23 = arith.mulf %19, %22 : vector<8x1xf32>
    %24 = vector.broadcast %23 : vector<8x1xf32> to vector<8x128xf32>
    %25 = arith.mulf %16, %24 : vector<8x128xf32>
    %c0_12 = arith.constant 0 : index
    %c0_13 = arith.constant 0 : index
    %c0_14 = arith.constant 0 : index
    %26 = vector.load %arg7[%c0_12, %c0_13, %c0_14] : memref<1x8x128xf32, #tpu.memory_space<vmem>>, vector<1x8x128xf32>
    %27 = vector.shape_cast %26 : vector<1x8x128xf32> to vector<8x128xf32>
    %28 = vector.shape_cast %25 : vector<8x128xf32> to vector<1x8x128xf32>
    tpu.vector_store %arg7[%c0_12, %c0_13, %c0_14], %28 {strides = array<i32>} : memref<1x8x128xf32, #tpu.memory_space<vmem>>, vector<1x8x128xf32>,
    %c0_15 = arith.constant 0 : index
    %c0_16 = arith.constant 0 : index
    %c0_17 = arith.constant 0 : index
    %c0_18 = arith.constant 0 : index
    %29 = vector.load %arg5[%c0_15, %c0_16, %c0_17, %c0_18] : memref<1x1x128x8xf32, #tpu.memory_space<vmem>>, vector<1x1x128x8xf32>
    %30 = vector.shape_cast %29 : vector<1x1x128x8xf32> to vector<128x8xf32>
    %cst_19 = arith.constant dense<0.000000e+00> : vector<8x8xf32>
    %31 = tpu.matmul %25, %30, %cst_19 {dimension_numbers = #tpu.dot_dimension_numbers<[1], [0], [0], [1], [0, 0, 1, 1], [], []>} : vector<8x128xf32>, vector<128x8xf32>, vector<8x8xf32> -> vector<8x8xf32>
    %c0_20 = arith.constant 0 : index
    %c0_21 = arith.constant 0 : index
    %c0_22 = arith.constant 0 : index
    %c0_23 = arith.constant 0 : index
    %32 = vector.load %arg6[%c0_20, %c0_21, %c0_22, %c0_23] : memref<1x1x8x8xf32, #tpu.memory_space<vmem>>, vector<1x1x8x8xf32>
    %33 = vector.shape_cast %32 : vector<1x1x8x8xf32> to vector<8x8xf32>
    %34 = vector.shape_cast %31 : vector<8x8xf32> to vector<1x1x8x8xf32>
    tpu.vector_store %arg6[%c0_20, %c0_21, %c0_22, %c0_23], %34 {strides = array<i32>} : memref<1x1x8x8xf32, #tpu.memory_space<vmem>>, vector<1x1x8x8xf32>,
    return
  }
  func.func @transform_0(%arg0: i32, %arg1: i32, %arg2: i32) -> (i32, i32, i32, i32) {
    %c0_i32 = arith.constant 0 : i32
    %c0_i32_0 = arith.constant 0 : i32
    return %arg0, %arg1, %arg2, %c0_i32 : i32, i32, i32, i32
  }
  func.func @transform_1(%arg0: i32, %arg1: i32, %arg2: i32) -> (i32, i32, i32, i32) {
    %c0_i32 = arith.constant 0 : i32
    %c0_i32_0 = arith.constant 0 : i32
    %c0_i32_1 = arith.constant 0 : i32
    return %arg0, %arg1, %c0_i32, %c0_i32_0 : i32, i32, i32, i32
  }
  func.func @transform_2(%arg0: i32, %arg1: i32, %arg2: i32) -> (i32, i32, i32, i32) {
    %c0_i32 = arith.constant 0 : i32
    %c0_i32_0 = arith.constant 0 : i32
    %c0_i32_1 = arith.constant 0 : i32
    return %arg0, %arg1, %c0_i32, %c0_i32_0 : i32, i32, i32, i32
  }
  func.func @transform_3(%arg0: i32, %arg1: i32, %arg2: i32) -> (i32, i32, i32, i32) {
    %c0_i32 = arith.constant 0 : i32
    %c0_i32_0 = arith.constant 0 : i32
    return %arg0, %arg1, %arg2, %c0_i32 : i32, i32, i32, i32
  }
  func.func @transform_4(%arg0: i32, %arg1: i32, %arg2: i32) -> (i32, i32, i32) {
    %c0_i32 = arith.constant 0 : i32
    return %arg0, %arg2, %arg1 : i32, i32, i32
  }
}

module attributes {stable_mosaic.version = 11 : i64} {
  func.func @_linear_kernel(%arg0: i32, %arg1: i32, %arg2: memref<16x32xf32, #tpu.memory_space<vmem>>, %arg3: memref<32x32xf32, #tpu.memory_space<vmem>>, %arg4: memref<1x32xf32, #tpu.memory_space<vmem>>, %arg5: memref<16x32xf32, #tpu.memory_space<vmem>>) attributes {dimension_semantics = [#tpu.dimension_semantics<parallel>, #tpu.dimension_semantics<parallel>], iteration_bounds = array<i64: 1, 1>, scalar_prefetch = 0 : i64, scratch_operands = 0 : i64, tpu.core_type = #tpu.core_type<tc>, window_params = [{transform_indices = @transform_0, window_bounds = array<i64: 16, 32>}, {transform_indices = @transform_1, window_bounds = array<i64: 32, 32>}, {transform_indices = @transform_2, window_bounds = array<i64: 1, 32>}, {transform_indices = @transform_3, window_bounds = array<i64: 16, 32>}]} {
    %c0 = arith.constant 0 : index
    %c0_0 = arith.constant 0 : index
    %0 = vector.load %arg2[%c0, %c0_0] : memref<16x32xf32, #tpu.memory_space<vmem>>, vector<16x32xf32>
    %c0_1 = arith.constant 0 : index
    %c0_2 = arith.constant 0 : index
    %1 = vector.load %arg3[%c0_1, %c0_2] : memref<32x32xf32, #tpu.memory_space<vmem>>, vector<32x32xf32>
    %cst = arith.constant dense<0.000000e+00> : vector<16x32xf32>
    %2 = tpu.matmul %0, %1, %cst {dimension_numbers = #tpu.dot_dimension_numbers<[1], [0], [0], [1], [0, 0, 1, 1], [], []>} : vector<16x32xf32>, vector<32x32xf32>, vector<16x32xf32> -> vector<16x32xf32>
    %c0_3 = arith.constant 0 : index
    %c0_4 = arith.constant 0 : index
    %3 = vector.load %arg4[%c0_3, %c0_4] : memref<1x32xf32, #tpu.memory_space<vmem>>, vector<1x32xf32>
    %4 = vector.broadcast %3 : vector<1x32xf32> to vector<16x32xf32>
    %5 = arith.addf %2, %4 : vector<16x32xf32>
    %c0_5 = arith.constant 0 : index
    %c0_6 = arith.constant 0 : index
    %6 = vector.load %arg5[%c0_5, %c0_6] : memref<16x32xf32, #tpu.memory_space<vmem>>, vector<16x32xf32>
    tpu.vector_store %arg5[%c0_5, %c0_6], %5 {strides = array<i32>} : memref<16x32xf32, #tpu.memory_space<vmem>>, vector<16x32xf32>,
    return
  }
  func.func @transform_0(%arg0: i32, %arg1: i32) -> (i32, i32) {
    %c0_i32 = arith.constant 0 : i32
    %c0_i32_0 = arith.constant 0 : i32
    return %arg1, %c0_i32 : i32, i32
  }
  func.func @transform_1(%arg0: i32, %arg1: i32) -> (i32, i32) {
    %c0_i32 = arith.constant 0 : i32
    %c0_i32_0 = arith.constant 0 : i32
    return %c0_i32, %arg0 : i32, i32
  }
  func.func @transform_2(%arg0: i32, %arg1: i32) -> (i32, i32) {
    %c0_i32 = arith.constant 0 : i32
    %c0_i32_0 = arith.constant 0 : i32
    return %c0_i32, %arg0 : i32, i32
  }
  func.func @transform_3(%arg0: i32, %arg1: i32) -> (i32, i32) {
    %c0_i32 = arith.constant 0 : i32
    return %arg1, %arg0 : i32, i32
  }
}

</mosaic_0001>

<bundles_post_ra>
// kernel: general_multi_head_attention_forward.4
= control target key start
LH: loop header
LB: loop body
LE: loop exit
PB: predicated region body
PF: predicated region fallthrough
CT: control target
= control target key end

     0   :  { %vm27_vm0 = vcmask 261120   ;;  %s186_s1 = inlined_call_operand.vmem [shape: f32[32,32], index: 1, kind: input, shape index: {}]   ;;  %s187_s0 = inlined_call_operand.vmem [shape: f32[16,32], index: 0, kind: input, shape index: {}]   ;;  %s188_s2 = inlined_call_operand.vmem [shape: f32[1,32], index: 2, kind: input, shape index: {}]   ;;  %s189_s3 = inlined_call_operand.vmem [shape: f32[16,32], index: 3, kind: output, shape index: {}]  }
   0x1   :  { %v19_v0 = vld [vmem:[%s186_s1 + $0x18] sm:$0xff]  ;;  %v18_v1 = vld [vmem:[%s186_s1 + $0x10] sm:$0xff]  ;;  %v14_v2 = vld [vmem:[%s187_s0] sm:$0xff] }
   0x2   :  { %124 = vmatprep.subr.mxu0 %v19_v0  ;;  %v17_v3 = vld [vmem:[%s186_s1 + $0x8] sm:$0xff]  ;;  %132 = vmatprep.mubr.msk.f32.mxu0 %vm27_vm0, %v14_v2  ;;  %v16_v4 = vld [vmem:[%s186_s1] sm:$0xff] }
   0x3   :  { %125 = vmatpush3.msra.mxu0 %v19_v0  ;;  %v15_v5 = vld [vmem:[%s187_s0 + $0x8] sm:$0xff]  ;;  %v115_v6 = vld [vmem:[%s188_s2] ss:$0 sm:$0xff] }
   0x4   :  { %126 = vmatprep.subr.mxu0 %v18_v1 }
   0x5   :  { %127 = vmatpush3.msra.mxu0 %v18_v1 }
   0x6   :  { %128 = vmatprep.subr.mxu0 %v17_v3 }
   0x7   :  { %129 = vmatpush3.msra.mxu0 %v17_v3 }
   0x8   :  { %130 = vmatprep.subr.mxu0 %v16_v4 }
   0x9   :  { %131 = vmatpush3.msra.mxu0 %v16_v4 }
   0xa   :  { %133 = vmatmul.mubr.msk.f32.vlgmr.msra.gmra.mxu0 %vm27_vm0, %v15_v5 }
  0xca   :  { %v134_v7 = vpop.f32.mrf.mxu0 }
  0xcb   :  { %v106_v8 = vadd.f32 %v134_v7, %v115_v6 }
  0xcc   :  { %v100_v9 = vpop.f32.mrf.mxu0 }
  0xcd   :  { %110 = vst.msk [vmem:[%s189_s3 + $0x8] sm:$0xff] %vm27_vm0, %v106_v8  ;;  %v101_v10 = vadd.f32 %v115_v6, %v100_v9 }
  0xcf   :  { %109 = vst.msk [vmem:[%s189_s3] sm:$0xff] %vm27_vm0, %v101_v10 }

// kernel: general_multi_head_attention_forward.5
= control target key start
LH: loop header
LB: loop body
LE: loop exit
PB: predicated region body
PF: predicated region fallthrough
CT: control target
= control target key end

     0   :  { %8 = vsyncpa [#allocation3], 0  ;;  %s176_s12 = smov [#allocation2]   ;;  %s219_s0 = inlined_call_operand.vmem [shape: f32[16,32], index: 0, kind: input, shape index: {}]   ;;  %s220_s1 = inlined_call_operand.hbm [shape: f32[32,64], index: 1, kind: input, shape index: {}]   ;;  %s221_s2 = inlined_call_operand.vmem [shape: f32[1,64], index: 2, kind: input, shape index: {}]   ;;  %s222_s3 = inlined_call_operand.vmem [shape: f32[16,64], index: 3, kind: output, shape index: {}]  }
   0x1   :  { %s16_s13 = sshll.u32 %s176_s12, 4  ;;  %s17_s13 = int_to_ptr.vmem [resolvable:$true] %s16_s13 }
   0x2   :  { %s162_s14 = scalar_lea.vmem %s17_s13, 512  ;;  %p167_p1 = scmp.lt.s32.totalorder %s17_s13, %s17_s13 }
   0x3   :  { %p163_p0 = scmp.ne.s32.totalorder %s17_s13, %s162_s14  ;;  %p168_p2 = scmp.lt.s32.totalorder %s162_s14, %s162_s14 }
   0x5   :  { %p169_p3 = por %p168_p2, %p167_p1 }
   0x7   :  { %p170_p4 = pnand %p169_p3, %p163_p0 }
   0x9   :  { %173 = shalt.err (!%p170_p4)
}
   0xa   :  { %s177_s15 = smov 128   ;;  %s178_s16 = smov 8  }
   0xb   :  { %22 = dma.hbm_to_vmem [thread:$0]  %s220_s1, 512, %s17_s13, [#allocation3], %s177_s15, %s177_s15, %s178_s16  }
   0xc   :  { %174 = dma.done.wait [#allocation3], 512  }
   0xd   :  { %175 = vsyncadd [#allocation3], 4294966784  ;;  %vm41_vm0 = vcmask 261120   ;;  %v33_v0 = vld [vmem:[#allocation2 + $0x18] sm:$0xff]  ;;  %v32_v1 = vld [vmem:[#allocation2 + $0x10] sm:$0xff]  ;;  %vm123_vm1 = vcmask 523264  }
   0xe   :  { %140 = vmatprep.subr.mxu0 %v33_v0  ;;  %v28_v2 = vld [vmem:[%s219_s0] sm:$0xff]  ;;  %v31_v3 = vld [vmem:[#allocation2 + $0x8] sm:$0xff] }
   0xf   :  { %141 = vmatpush3.msra.mxu0 %v33_v0  ;;  %148 = vmatprep.mubr.msk.f32.mxu0 %vm41_vm0, %v28_v2  ;;  %v30_v4 = vld [vmem:[#allocation2] sm:$0xff]  ;;  %v29_v5 = vld [vmem:[%s219_s0 + $0x8] sm:$0xff] }
  0x10   :  { %142 = vmatprep.subr.mxu0 %v32_v1  ;;  %v131_v6 = vld [vmem:[%s221_s2] ss:$0 sm:$0xff] }
  0x11   :  { %143 = vmatpush3.msra.mxu0 %v32_v1 }
  0x12   :  { %144 = vmatprep.subr.mxu0 %v31_v3 }
  0x13   :  { %145 = vmatpush3.msra.mxu0 %v31_v3 }
  0x14   :  { %146 = vmatprep.subr.mxu0 %v30_v4 }
  0x15   :  { %147 = vmatpush3.msra.mxu0 %v30_v4 }
  0x16   :  { %149 = vmatmul.mubr.msk.f32.vlgmr.msra.gmra.mxu0 %vm41_vm0, %v29_v5 }
  0xd6   :  { %v150_v7 = vpop.f32.mrf.mxu0 }
  0xd7   :  { %v120_v8 = vadd.f32 %v150_v7, %v131_v6 }
  0xd8   :  { %v114_v9 = vpop.f32.mrf.mxu0 }
  0xd9   :  { %125 = vst.msk [vmem:[%s222_s3 + $0x8] sm:$0xff] %vm123_vm1, %v120_v8  ;;  %v115_v10 = vadd.f32 %v131_v6, %v114_v9 }
  0xdb   :  { %124 = vst.msk [vmem:[%s222_s3] sm:$0xff] %vm123_vm1, %v115_v10 }
  0xdc   :  { %130 = vsyncpa [#allocation3], 1 }

// kernel: general_multi_head_attention_forward.6
= control target key start
LH: loop header
LB: loop body
LE: loop exit
PB: predicated region body
PF: predicated region fallthrough
CT: control target
= control target key end

     0   :  { %s1058_s15 = smov 0   ;;  %s1060_s16 = smov 0   ;;  %s1226_s0 = inlined_call_operand.vmem [shape: f32[2,4,8,8], index: 0, kind: input, shape index: {}]   ;;  %s1227_s1 = inlined_call_operand.vmem [shape: f32[2,4,128,8], index: 1, kind: input, shape index: {}]   ;;  %s1228_s2 = inlined_call_operand.vmem [shape: f32[2,4,128,8], index: 2, kind: input, shape index: {}]   ;;  %s1229_s3 = inlined_call_operand.vmem [shape: f32[2,4,8,8], index: 3, kind: output, shape index: {0}]   ;;  %s1230_s4 = inlined_call_operand.vmem [shape: f32[2,8,512], index: 4, kind: output, shape index: {1}]  }
   0x1   :  { %s1062_s17 = smov 0   ;;  %s1064_s18 = smov 0  }
   0x2   :  { %s1066_s19 = smov 0  }
   0x3 LB: > { %s30_s20 = sadd.s32 1, %s1021_s17  ;;  %s34_s21 = sadd.s32 1, %s1025_s18  ;;  %s1029_s19 = sphi %s1066_s19, %s15_s19   ;;  %s1025_s18 = sphi %s1064_s18, %s1234_s18   ;;  %s1021_s17 = sphi %s1062_s17, %s1233_s17   ;;  %s1017_s16 = sphi %s1060_s16, %s1232_s16   ;;  %s1013_s15 = sphi %s1058_s15, %s1231_s15  }
   0x4   : > { %p32_p0 = scmp.ge.s32.totalorder %s30_s20, 4  ;;  %p809_p1 = scmp.ge.s32.totalorder %s1029_s19, 1 }
   0x5   : > { %p234_p2 = scmp.lt.s32.totalorder %s1029_s19, 9 }
   0x6   : > { %s1236_s20 = smov (%p32_p0, %s30_s20), 0  ;;  %s1238_s21 = smov (!%p32_p0, %s34_s21), %s1025_s18 }
   0x7   : > { %p235_p3 = pnand %p809_p1, %p234_p2  ;;  %p36_p4 = scmp.ge.s32.totalorder %s1238_s21, 2 }
   0x8   : > { %p302_p5 = scmp.lt.s32.totalorder (!%p235_p3), %s1017_s16, 1  ;;  %p304_p6 = scmp.lt.s32.totalorder (!%p235_p3), %s1013_s15, 3 }
   0x9   : > { %s1240_s21 = smov (%p36_p4, %s1238_s21), 0  ;;  %238 = sbr.rel (%p235_p3) target bundleno = 788 (0x314), region = 32 }
   0xe   : > { %v1031_v0 = vmov 0.0   ;;  %vm1032_vm0 = vmmov 0   ;;  %s1242_s16 = smov (!%p302_p5, %s1017_s16), 1  ;;  %s1244_s15 = smov (!%p304_p6, %s1013_s15), 3  ;;  %vm372_vm1 = vcmask 64512   ;;  %v494_v19 = vlaneseq }
   0xf   : > { %875 = vmatprep.subr.mxu0 %v1031_v0  ;;  %907 = vmatprep.mubr.msk.f32.mxu0 %vm1032_vm0, %v1031_v0  ;;  %s813_s22 = sshll.u32 %s1242_s16, 6  ;;  %s812_s23 = sshll.u32 %s1244_s15, 4 }
  0x10   : > { %910 = vmatprep.subr.mxu1 %v1031_v0  ;;  %942 = vmatprep.mubr.msk.f32.mxu1 %vm1032_vm0, %v1031_v0  ;;  %s1098_s24 = sadd.s32 %s813_s22, %s812_s23  ;;  %s810_s29 = sshll.u32 %s1242_s16, 2  ;;  %v495_v20 = vand.u32 127, %v494_v19 }
  0x11   : > { %s814_s25 = sshll.u32 %s1098_s24, 3  ;;  %s310_s30 = sadd.s32 %s810_s29, %s1244_s15 }
  0x12   : > { %s1106_s28 = scalar_lea.vmem %s1227_s1, %s814_s25  ;;  %s1150_s5 = sshll.u32 %s310_s30, 3  ;;  %vm496_vm2 = vcmp.lt.s32.totalorder %v495_v20, 8 }
  0x13   : > { %v371_v1 = vld [vmem:[%s1106_s28 + $0x78] sm:$0xff]  ;;  %v370_v2 = vld [vmem:[%s1106_s28 + $0x70] sm:$0xff]  ;;  %v369_v3 = vld [vmem:[%s1106_s28 + $0x68] sm:$0xff]  ;;  %s312_s8 = scalar_lea.vmem %s1226_s0, %s1150_s5  ;;  %s1169_s11 = scalar_lea.vmem %s1228_s2, %s814_s25 }
  0x14   : > { %876 = vmatpush3.xpose.msk.msra.mxu0 %vm372_vm1, %v371_v1  ;;  %v368_v4 = vld [vmem:[%s1106_s28 + $0x60] sm:$0xff]  ;;  %v367_v5 = vld [vmem:[%s1106_s28 + $0x58] sm:$0xff]  ;;  %v366_v6 = vld [vmem:[%s1106_s28 + $0x50] sm:$0xff]  ;;  %s353_s14 = scalar_lea.vmem %s1230_s4, %s1150_s5  ;;  %s341_s22 = scalar_lea.vmem %s1229_s3, %s1150_s5 }
  0x15   : > { %877 = vmatprep.subr.mxu0 %v1031_v0  ;;  %v365_v7 = vld [vmem:[%s1106_s28 + $0x48] sm:$0xff]  ;;  %v364_v8 = vld [vmem:[%s1106_s28 + $0x40] sm:$0xff]  ;;  %v363_v9 = vld [vmem:[%s1106_s28 + $0x38] sm:$0xff] }
  0x16   : > { %v362_v10 = vld [vmem:[%s1106_s28 + $0x30] sm:$0xff]  ;;  %v361_v11 = vld [vmem:[%s1106_s28 + $0x28] sm:$0xff]  ;;  %v360_v12 = vld [vmem:[%s1106_s28 + $0x20] sm:$0xff] }
  0x17   : > { %v359_v13 = vld [vmem:[%s1106_s28 + $0x18] sm:$0xff]  ;;  %v358_v14 = vld [vmem:[%s1106_s28 + $0x10] sm:$0xff]  ;;  %v357_v15 = vld [vmem:[%s1106_s28 + $0x8] sm:$0xff] }
  0x18   : > { %878 = vmatpush3.xpose.msk.msra.mxu0 %vm372_vm1, %v370_v2  ;;  %v354_v16 = vld [vmem:[%s312_s8] sm:$0xff]  ;;  %v526_v24 = vld [vmem:[%s1169_s11 + $0x78] sm:$0xff]  ;;  %v525_v25 = vld [vmem:[%s1169_s11 + $0x70] sm:$0xff] }
  0x19   : > { %879 = vmatprep.subr.mxu0 %v1031_v0  ;;  %v356_v17 = vld [vmem:[%s1106_s28] sm:$0xff]  ;;  %v355_v18 = vmul.f32 0.35355338, %v354_v16  ;;  %911 = vmatpush3.msra.mxu1 %v526_v24  ;;  %v524_v26 = vld [vmem:[%s1169_s11 + $0x68] sm:$0xff]  ;;  %v522_v28 = vld [vmem:[%s1169_s11 + $0x58] sm:$0xff] }
  0x1a   : > { %912 = vmatprep.subr.mxu1 %v1031_v0  ;;  %v523_v27 = vld [vmem:[%s1169_s11 + $0x60] sm:$0xff]  ;;  %v521_v33 = vld [vmem:[%s1169_s11 + $0x50] sm:$0xff]  ;;  %v520_v34 = vld [vmem:[%s1169_s11 + $0x48] sm:$0xff] }
  0x1b   : > { %913 = vmatpush3.msra.mxu1 %v525_v25  ;;  %v519_v35 = vld [vmem:[%s1169_s11 + $0x40] sm:$0xff]  ;;  %v518_v36 = vld [vmem:[%s1169_s11 + $0x38] sm:$0xff]  ;;  %v517_v37 = vld [vmem:[%s1169_s11 + $0x30] sm:$0xff] }
  0x1c   : > { %880 = vmatpush3.xpose.msk.msra.mxu0 %vm372_vm1, %v369_v3  ;;  %914 = vmatprep.subr.mxu1 %v1031_v0  ;;  %v516_v38 = vld [vmem:[%s1169_s11 + $0x28] sm:$0xff]  ;;  %v515_v39 = vld [vmem:[%s1169_s11 + $0x20] sm:$0xff]  ;;  %v514_v40 = vld [vmem:[%s1169_s11 + $0x18] sm:$0xff] }
  0x1d   : > { %881 = vmatprep.subr.mxu0 %v1031_v0  ;;  %915 = vmatpush3.msra.mxu1 %v524_v26  ;;  %v513_v41 = vld [vmem:[%s1169_s11 + $0x10] sm:$0xff]  ;;  %v512_v42 = vld [vmem:[%s1169_s11 + $0x8] sm:$0xff]  ;;  %v511_v43 = vld [vmem:[%s1169_s11] sm:$0xff] }
  0x1e   : > { %916 = vmatprep.subr.mxu1 %v1031_v0 }
  0x1f   : > { %917 = vmatpush3.msra.mxu1 %v523_v27 }
  0x20   : > { %882 = vmatpush3.xpose.msk.msra.mxu0 %vm372_vm1, %v368_v4  ;;  %918 = vmatprep.subr.mxu1 %v1031_v0 }
  0x21   : > { %883 = vmatprep.subr.mxu0 %v1031_v0  ;;  %919 = vmatpush3.msra.mxu1 %v522_v28 }
  0x22   : > { %920 = vmatprep.subr.mxu1 %v1031_v0 }
  0x23   : > { %921 = vmatpush3.msra.mxu1 %v521_v33 }
  0x24   : > { %884 = vmatpush3.xpose.msk.msra.mxu0 %vm372_vm1, %v367_v5  ;;  %922 = vmatprep.subr.mxu1 %v1031_v0 }
  0x25   : > { %885 = vmatprep.subr.mxu0 %v1031_v0  ;;  %923 = vmatpush3.msra.mxu1 %v520_v34 }
  0x26   : > { %924 = vmatprep.subr.mxu1 %v1031_v0 }
  0x27   : > { %925 = vmatpush3.msra.mxu1 %v519_v35 }
  0x28   : > { %886 = vmatpush3.xpose.msk.msra.mxu0 %vm372_vm1, %v366_v6  ;;  %926 = vmatprep.subr.mxu1 %v1031_v0 }
  0x29   : > { %887 = vmatprep.subr.mxu0 %v1031_v0  ;;  %927 = vmatpush3.msra.mxu1 %v518_v36 }
  0x2a   : > { %928 = vmatprep.subr.mxu1 %v1031_v0 }
  0x2b   : > { %929 = vmatpush3.msra.mxu1 %v517_v37 }
  0x2c   : > { %888 = vmatpush3.xpose.msk.msra.mxu0 %vm372_vm1, %v365_v7  ;;  %930 = vmatprep.subr.mxu1 %v1031_v0 }
  0x2d   : > { %889 = vmatprep.subr.mxu0 %v1031_v0  ;;  %931 = vmatpush3.msra.mxu1 %v516_v38 }
  0x2e   : > { %932 = vmatprep.subr.mxu1 %v1031_v0 }
  0x2f   : > { %933 = vmatpush3.msra.mxu1 %v515_v39 }
  0x30   : > { %890 = vmatpush3.xpose.msk.msra.mxu0 %vm372_vm1, %v364_v8  ;;  %934 = vmatprep.subr.mxu1 %v1031_v0 }
  0x31   : > { %891 = vmatprep.subr.mxu0 %v1031_v0  ;;  %935 = vmatpush3.msra.mxu1 %v514_v40 }
  0x32   : > { %936 = vmatprep.subr.mxu1 %v1031_v0 }
  0x33   : > { %937 = vmatpush3.msra.mxu1 %v513_v41 }
  0x34   : > { %892 = vmatpush3.xpose.msk.msra.mxu0 %vm372_vm1, %v363_v9  ;;  %938 = vmatprep.subr.mxu1 %v1031_v0 }
  0x35   : > { %893 = vmatprep.subr.mxu0 %v1031_v0  ;;  %939 = vmatpush3.msra.mxu1 %v512_v42 }
  0x36   : > { %940 = vmatprep.subr.mxu1 %v1031_v0 }
  0x37   : > { %941 = vmatpush3.msra.mxu1 %v511_v43 }
  0x38   : > { %894 = vmatpush3.xpose.msk.msra.mxu0 %vm372_vm1, %v362_v10 }
  0x39   : > { %895 = vmatprep.subr.mxu0 %v1031_v0 }
  0x3c   : > { %896 = vmatpush3.xpose.msk.msra.mxu0 %vm372_vm1, %v361_v11 }
  0x3d   : > { %897 = vmatprep.subr.mxu0 %v1031_v0 }
  0x40   : > { %898 = vmatpush3.xpose.msk.msra.mxu0 %vm372_vm1, %v360_v12 }
  0x41   : > { %899 = vmatprep.subr.mxu0 %v1031_v0 }
  0x44   : > { %900 = vmatpush3.xpose.msk.msra.mxu0 %vm372_vm1, %v359_v13 }
  0x45   : > { %901 = vmatprep.subr.mxu0 %v1031_v0 }
  0x48   : > { %902 = vmatpush3.xpose.msk.msra.mxu0 %vm372_vm1, %v358_v14 }
  0x49   : > { %903 = vmatprep.subr.mxu0 %v1031_v0 }
  0x4c   : > { %904 = vmatpush3.xpose.msk.msra.mxu0 %vm372_vm1, %v357_v15 }
  0x4d   : > { %905 = vmatprep.subr.mxu0 %v1031_v0 }
  0x50   : > { %906 = vmatpush3.xpose.msk.msra.mxu0 %vm372_vm1, %v356_v17 }
  0x53   : > { %908 = vmatmul.mubr.msk.f32.vlgmr.msra.gmra.mxu0 %vm372_vm1, %v355_v18 }
 0x113   : > { %v490_v21 = vpop.f32.mrf.mxu0 }
 0x114   : > { %v497_v22 = vsel %vm496_vm2, %v490_v21, -inf }
 0x115   : > { %498 = vmax.xlane.f32.xlu0 %v497_v22  ;;  %v909_v23 = vpop.f32.mrf.mxu0 }
 0x19e   : > { %v499_v29 = vpop.xlane.xlu0 %498 }
 0x19f   : > { %v500_v30 = vsub.f32 %v497_v22, %v499_v29 }
 0x1a1   : > { %v501_v31 = vmul.f32 1.442695, %v500_v30 }
 0x1a3   : > { %987 = vpow2.f32 %v501_v31 }
 0x1b0   : > { %v988_v32 = vpop.eup %987 }
 0x1b1   : > { %503 = vadd.xlane.f32.xlu0 %v988_v32 }
 0x23a   : > { %v504_v44 = vpop.xlane.xlu0 %503 }
 0x23b   : > { %989 = vrcp.f32 %v504_v44 }
 0x248   : > { %v990_v45 = vpop.eup %989 }
 0x249   : > { %v506_v46 = vmul.f32 %v990_v45, %v504_v44 }
 0x24b   : > { %v507_v47 = vsub.f32 2.0, %v506_v46 }
 0x24d   : > { %v508_v48 = vmul.f32 %v990_v45, %v507_v47 }
 0x24f   : > { %v509_v49 = vmul.f32 %v988_v32, %v508_v48 }
 0x251   : > { %510 = vst [vmem:[%s353_s14] sm:$0xff] %v509_v49  ;;  %943 = vmatmul.mubr.f32.vlgmr.msra.gmra.mxu1 %v509_v49 }
 0x311   : > { %v593_v50 = vpop.f32.mrf.mxu1 }
 0x312   : > { %597 = vst.msk [vmem:[%s341_s22] sm:$0xff] %vm372_vm1, %v593_v50 }
 0x313   : > { %v944_v51 = vpop.f32.mrf.mxu1 }
 0x314 PF: > { %s15_s19 = sadd.s32 1, %s1029_s19   ;;  %s1231_s15 = smov %s1021_s17 }
 0x315   : > { %p12_p7 = scmp.ge.s32.totalorder %s15_s19, 10   ;;  %s1232_s16 = smov %s1025_s18 }
 0x316   : > { %s1233_s17 = smov %s1236_s20  ;;  %s1234_s18 = smov %s1240_s21 }
 0x317   :  { %14 = sbr.rel (!%p12_p7) target bundleno = 3 (0x3), region = 80 }

// kernel: general_multi_head_attention_forward.7
= control target key start
LH: loop header
LB: loop body
LE: loop exit
PB: predicated region body
PF: predicated region fallthrough
CT: control target
= control target key end

     0   :  { %vm28_vm0 = vcmask 261120   ;;  %s224_s0 = inlined_call_operand.vmem [shape: f32[16,32], index: 0, kind: input, shape index: {}]   ;;  %s225_s1 = inlined_call_operand.vmem [shape: f32[32,32], index: 1, kind: input, shape index: {}]   ;;  %s226_s2 = inlined_call_operand.vmem [shape: f32[1,32], index: 2, kind: input, shape index: {}]   ;;  %s227_s3 = inlined_call_operand.hbm [shape: f32[16,32], index: 3, kind: output, shape index: {}]  }
   0x1   :  { %v20_v0 = vld [vmem:[%s225_s1 + $0x18] sm:$0xff]  ;;  %v19_v1 = vld [vmem:[%s225_s1 + $0x10] sm:$0xff]  ;;  %v15_v2 = vld [vmem:[%s224_s0] sm:$0xff] }
   0x2   :  { %137 = vmatprep.subr.mxu0 %v20_v0  ;;  %v18_v3 = vld [vmem:[%s225_s1 + $0x8] sm:$0xff]  ;;  %145 = vmatprep.mubr.msk.f32.mxu0 %vm28_vm0, %v15_v2 }
   0x3   :  { %138 = vmatpush3.msra.mxu0 %v20_v0 }
   0x4   :  { %8 = vsyncpa [#allocation3], 0  ;;  %139 = vmatprep.subr.mxu0 %v19_v1  ;;  %v17_v4 = vld [vmem:[%s225_s1] sm:$0xff]  ;;  %v16_v5 = vld [vmem:[%s224_s0 + $0x8] sm:$0xff]  ;;  %s173_s26 = smov [#allocation2]  }
   0x5   :  { %140 = vmatpush3.msra.mxu0 %v19_v1  ;;  %v128_v6 = vld [vmem:[%s226_s2] ss:$0 sm:$0xff]  ;;  %s117_s27 = sshll.u32 %s173_s26, 4  ;;  %s118_s27 = int_to_ptr.vmem [resolvable:$true] %s117_s27 }
   0x6   :  { %141 = vmatprep.subr.mxu0 %v18_v3  ;;  %s151_s0 = scalar_lea.vmem %s118_s27, 256  ;;  %p156_p1 = scmp.lt.s32.totalorder %s118_s27, %s118_s27 }
   0x7   :  { %142 = vmatpush3.msra.mxu0 %v18_v3  ;;  %p152_p0 = scmp.ne.s32.totalorder %s118_s27, %s151_s0  ;;  %p157_p2 = scmp.lt.s32.totalorder %s151_s0, %s151_s0 }
   0x8   :  { %143 = vmatprep.subr.mxu0 %v17_v4 }
   0x9   :  { %144 = vmatpush3.msra.mxu0 %v17_v4  ;;  %p158_p3 = por %p157_p2, %p156_p1 }
   0xa   :  { %146 = vmatmul.mubr.msk.f32.vlgmr.msra.gmra.mxu0 %vm28_vm0, %v16_v5 }
   0xb   :  { %p159_p4 = pnand %p158_p3, %p152_p0 }
  0xca   :  { %v147_v7 = vpop.f32.mrf.mxu0 }
  0xcb   :  { %v107_v8 = vadd.f32 %v147_v7, %v128_v6 }
  0xcc   :  { %v101_v9 = vpop.f32.mrf.mxu0 }
  0xcd   :  { %111 = vst.msk [vmem:[#allocation2 + $0x8] sm:$0xff] %vm28_vm0, %v107_v8  ;;  %v102_v10 = vadd.f32 %v128_v6, %v101_v9 }
  0xcf   :  { %110 = vst.msk [vmem:[#allocation2] sm:$0xff] %vm28_vm0, %v102_v10 }
  0xd0   :  { %162 = shalt.err (!%p159_p4)
}
  0xd1   :  { %s174_s1 = smov 128   ;;  %s175_s2 = smov 8  }
  0xd2   :  { %123 = dma.vmem_to_hbm [thread:$0]  %s118_s27, 256, %s227_s3, [#allocation3], %s174_s1, %s174_s1, %s175_s2  }
  0xd3   :  { %171 = dma.done.wait [#allocation3], 256  }
  0xd4   :  { %172 = vsyncadd [#allocation3], 4294967040 }
  0xd5   :  { %127 = vsyncpa [#allocation3], 1 }

</bundles_post_ra>
